<compile_context>
chip_gen: v7x
topology: tpu7x:2x2x1
jax: 0.10.0
libtpu: 0.0.40
codegen_flags: <defaults>
</compile_context>

<pallas_src>
import functools

import jax
import jax.numpy as jnp
from jax.experimental import pallas as pl
from jax.experimental.pallas import tpu as pltpu


def _round_up(x, m):
    return (x + m - 1) // m * m


def _hm_loss_kernel(x_ref, feat_ref, lab_ref, tgt_ref, o_ref, sim_acc, cnt_acc,
                    *, temp, batch, n_samples, needs_mask):
    k = pl.program_id(0)

    @pl.when(k == 0)
    def _init():
        sim_acc[...] = jnp.zeros_like(sim_acc)
        cnt_acc[...] = jnp.zeros_like(cnt_acc)

    x = x_ref[...]                                   # (B_pad, F)  bf16, resident
    feat = feat_ref[...].astype(jnp.bfloat16)        # (Nt, F)     bank tile (cast in VMEM)
    labels = lab_ref[...]                            # (Nt, 1)     int32 tile

    nt = feat.shape[0]
    b_pad = x.shape[0]
    c_pad = sim_acc.shape[1]

    # logits tile = inputs @ features_tile.T  -> (B_pad, Nt), f32 MXU accumulation.
    logits = jax.lax.dot_general(
        x, feat, dimension_numbers=(((1,), (1,)), ((), ())),
        preferred_element_type=jnp.float32)

    # (Nt, C_pad) one-hot tile built in-kernel.
    class_iota = jax.lax.broadcasted_iota(jnp.int32, (nt, c_pad), 1)
    onehot = class_iota == labels

    if needs_mask:
        # The last tile over-runs the bank: zero its garbage rows/columns.
        rows_left = n_samples - k * nt
        row_iota = jax.lax.broadcasted_iota(jnp.int32, (nt, c_pad), 0)
        onehot = jnp.logical_and(onehot, row_iota < rows_left)
        col_iota = jax.lax.broadcasted_iota(jnp.int32, (b_pad, nt), 1)
        logits = jnp.where(col_iota < rows_left, logits, 0.0)

    onehot_f = onehot.astype(jnp.float32)

    # sim.index_add_(0, labels, logits.t())  ==  logits @ onehot  (per-class sums)
    sim_acc[...] += jnp.dot(logits, onehot_f, preferred_element_type=jnp.float32)
    cnt_acc[...] += jnp.sum(onehot_f, axis=0, keepdims=True)

    @pl.when(k == pl.num_programs(0) - 1)
    def _finalize():
        counts = cnt_acc[...]                                    # (1, C_pad)
        mask = (counts > 0.0).astype(jnp.float32)
        denom = mask * counts + (1.0 - mask)
        # per-class mean and the 1/temp scale folded into the small (B, C) result
        # (exact divides -- runs once, off the hot path).
        sim = sim_acc[...] * ((1.0 / temp) / denom)

        # masked softmax over classes (eps = 1e-6), all in f32.
        exps = jnp.exp(sim)
        masked_exps = exps * mask
        masked_sums = jnp.sum(masked_exps, axis=1, keepdims=True) + 1e-6
        masked_sim = masked_exps / masked_sums

        # F.nll_loss(log(masked_sim + 1e-8), targets), mean over the *real* batch.
        logp = jnp.log(masked_sim + 1e-8)
        per_sample = -jnp.sum(tgt_ref[...] * logp, axis=1, keepdims=True)  # (B_pad, 1)
        o_ref[...] = jnp.sum(per_sample, axis=0, keepdims=True) * (1.0 / batch)


@functools.partial(jax.jit, static_argnames=("num_classes", "temp", "block_n"))
def hybrid_memory_forward(inputs, indexes, features, labels, num_classes,
                          temp=0.05, block_n=None):
    """HybridMemory.forward loss. Cheap glue (batch padding, target one-hot) in
    JAX; the N-streaming hot path over the memory bank runs in Pallas, reading
    the bank straight from HBM with no extra copy."""
    B, F = inputs.shape
    N, F2 = features.shape
    assert F == F2

    B_pad = _round_up(B, 8)                       # sublane alignment
    C_pad = _round_up(num_classes, 128)           # lane alignment

    if block_n is None:
        # ~4 MiB of feature rows per pipeline buffer (double-buffered -> ~8 MiB).
        bytes_per_row = F * jnp.dtype(features.dtype).itemsize
        block_n = max(128, min(4096, (4 * 1024 * 1024) // max(bytes_per_row, 1)))
    Nt = min(_round_up(block_n, 8), _round_up(N, 8))
    grid_n = pl.cdiv(N, Nt)
    needs_mask = (N % Nt) != 0                    # static: masks only when required

    # Small operands only are re-materialized: inputs (bf16, B padded) and the
    # target one-hot (replaces the nll gather); padded batch rows are all zeros.
    x = jnp.zeros((B_pad, F), jnp.bfloat16).at[:B].set(inputs.astype(jnp.bfloat16))
    lab = labels.astype(jnp.int32).reshape(N, 1)
    targets = labels[indexes].astype(jnp.int32)
    tgt = jnp.zeros((B_pad, C_pad), jnp.float32).at[:B].set(
        jax.nn.one_hot(targets, C_pad, dtype=jnp.float32))

    kernel = functools.partial(_hm_loss_kernel, temp=float(temp), batch=B,
                               n_samples=N, needs_mask=needs_mask)

    loss = pl.pallas_call(
        kernel,
        out_shape=jax.ShapeDtypeStruct((1, 1), jnp.float32),
        grid_spec=pltpu.PrefetchScalarGridSpec(
            num_scalar_prefetch=0,
            grid=(grid_n,),
            in_specs=[
                pl.BlockSpec((B_pad, F), lambda k: (0, 0)),       # inputs (resident)
                pl.BlockSpec((Nt, F), lambda k: (k, 0)),          # feature-bank tile
                pl.BlockSpec((Nt, 1), lambda k: (k, 0)),          # labels tile (int32)
                pl.BlockSpec((B_pad, C_pad), lambda k: (0, 0)),   # target one-hot (resident)
            ],
            out_specs=pl.BlockSpec((1, 1), lambda k: (0, 0)),
            scratch_shapes=[
                pltpu.VMEM((B_pad, C_pad), jnp.float32),          # sim accumulator
                pltpu.VMEM((1, C_pad), jnp.float32),              # class counts
            ],
        ),
        compiler_params=pltpu.CompilerParams(
            dimension_semantics=("arbitrary",),
            vmem_limit_bytes=32 * 1024 * 1024,
        ),
    )(x, features, lab, tgt)
    return loss[0, 0]


def reference_forward(inputs, indexes, features, labels, num_classes, temp=0.05):
    """Pure-JAX f32 reference matching the torch forward."""
    inputs = inputs.astype(jnp.float32)
    features = features.astype(jnp.float32)
    logits = (inputs @ features.T) / temp
    onehot = jax.nn.one_hot(labels, num_classes, dtype=jnp.float32)
    sim = logits @ onehot
    counts = onehot.sum(0, keepdims=True)
    mask = (counts > 0).astype(jnp.float32)
    sim = sim / (mask * counts + (1.0 - mask))
    exps = jnp.exp(sim)
    me = exps * mask
    ms = me.sum(1, keepdims=True) + 1e-6
    masked_sim = me / ms
    targets = labels[indexes]
    logp = jnp.log(masked_sim + 1e-8)
    return -jnp.mean(logp[jnp.arange(inputs.shape[0]), targets])


# TODO(synk): the feature-bank EMA update (feature_dict bookkeeping in HM.backward,
# including the epoch-dependent momentum) is training-time state mutation with
# Python-dict semantics; it is not part of the forward pass and is not implemented here.

if __name__ == "__main__":
    key = jax.random.PRNGKey(0)
    k1, k2, k3, k4 = jax.random.split(key, 4)

    B, num_features, num_samples, num_classes = 4, 32, 18, 4

    # Deterministic "buffer" init. (The torch module zero-inits the memory bank,
    # which is degenerate; initialize with L2-normalized random rows instead.)
    features = jax.random.normal(k1, (num_samples, num_features), jnp.float32)
    features = features / jnp.linalg.norm(features, axis=-1, keepdims=True)
    labels = jax.random.randint(k2, (num_samples,), 0, num_classes, jnp.int32)

    inputs = jax.random.normal(k3, (B, num_features), jnp.float32)
    inputs = inputs / jnp.linalg.norm(inputs, axis=-1, keepdims=True)
    indexes = jax.random.randint(k4, (B,), 0, num_samples, jnp.int32)

    # block_n=8 with N=18 -> 3 grid steps, last one partial: exercises both the
    # accumulator path and the in-kernel boundary masking.
    loss = hybrid_memory_forward(inputs, indexes, features, labels,
                                 num_classes=num_classes, temp=0.05, block_n=8)
    jax.block_until_ready(loss)

    # Reference in f32 on the bf16-rounded operands (the kernel feeds bf16 to the
    # MXU with f32 accumulation).
    inputs_bf = inputs.astype(jnp.bfloat16).astype(jnp.float32)
    features_bf = features.astype(jnp.bfloat16).astype(jnp.float32)
    ref = reference_forward(inputs_bf, indexes, features_bf, labels,
                            num_classes, temp=0.05)
    assert jnp.allclose(loss, ref, atol=1e-2, rtol=1e-2), (float(loss), float(ref))
    print("KERNEL_OK")
</pallas_src>

<mosaic_0001>
module attributes {stable_mosaic.version = 11 : i64} {
  func.func @_hm_loss_kernel(%arg0: i32, %arg1: memref<8x32xbf16, #tpu.memory_space<vmem>>, %arg2: memref<8x32xf32, #tpu.memory_space<vmem>>, %arg3: memref<8x1xi32, #tpu.memory_space<vmem>>, %arg4: memref<8x128xf32, #tpu.memory_space<vmem>>, %arg5: memref<1x1xf32, #tpu.memory_space<vmem>>, %arg6: memref<8x128xf32, #tpu.memory_space<vmem>>, %arg7: memref<1x128xf32, #tpu.memory_space<vmem>>) attributes {dimension_semantics = [#tpu.dimension_semantics<arbitrary>], iteration_bounds = array<i64: 3>, scalar_prefetch = 0 : i64, scratch_operands = 2 : i64, tpu.core_type = #tpu.core_type<tc>, window_params = [{pipeline_mode = #tpu.pipeline_mode<synchronous>, transform_indices = @transform_0, window_bounds = array<i64: 8, 32>}, {transform_indices = @transform_1, window_bounds = array<i64: 8, 32>}, {transform_indices = @transform_2, window_bounds = array<i64: 8, 1>}, {pipeline_mode = #tpu.pipeline_mode<synchronous>, transform_indices = @transform_3, window_bounds = array<i64: 8, 128>}, {pipeline_mode = #tpu.pipeline_mode<synchronous>, transform_indices = @transform_4, window_bounds = array<i64: 1, 1>}]} {
    %c0_i32 = arith.constant 0 : i32
    %0 = arith.cmpi eq, %arg0, %c0_i32 : i32
    %1 = arith.extui %0 : i1 to i32
    %c0_i32_0 = arith.constant 0 : i32
    %2 = arith.cmpi ne, %1, %c0_i32_0 : i32
    scf.if %2 {
      %cst_18 = arith.constant 0.000000e+00 : f32
      %36 = vector.broadcast %cst_18 : f32 to vector<8x128xf32>
      %c0_19 = arith.constant 0 : index
      %c0_20 = arith.constant 0 : index
      %37 = vector.load %arg6[%c0_19, %c0_20] : memref<8x128xf32, #tpu.memory_space<vmem>>, vector<8x128xf32>
      tpu.vector_store %arg6[%c0_19, %c0_20], %36 {strides = array<i32>} : memref<8x128xf32, #tpu.memory_space<vmem>>, vector<8x128xf32>,
      %cst_21 = arith.constant 0.000000e+00 : f32
      %38 = vector.broadcast %cst_21 : f32 to vector<1x128xf32>
      %c0_22 = arith.constant 0 : index
      %c0_23 = arith.constant 0 : index
      %39 = vector.load %arg7[%c0_22, %c0_23] : memref<1x128xf32, #tpu.memory_space<vmem>>, vector<1x128xf32>
      tpu.vector_store %arg7[%c0_22, %c0_23], %38 {strides = array<i32>} : memref<1x128xf32, #tpu.memory_space<vmem>>, vector<1x128xf32>,
    } else {
    }
    %c0 = arith.constant 0 : index
    %c0_1 = arith.constant 0 : index
    %3 = vector.load %arg1[%c0, %c0_1] : memref<8x32xbf16, #tpu.memory_space<vmem>>, vector<8x32xbf16>
    %c0_2 = arith.constant 0 : index
    %c0_3 = arith.constant 0 : index
    %4 = vector.load %arg2[%c0_2, %c0_3] : memref<8x32xf32, #tpu.memory_space<vmem>>, vector<8x32xf32>
    %5 = arith.truncf %4 : vector<8x32xf32> to vector<8x32xbf16>
    %c0_4 = arith.constant 0 : index
    %c0_5 = arith.constant 0 : index
    %6 = vector.load %arg3[%c0_4, %c0_5] : memref<8x1xi32, #tpu.memory_space<vmem>>, vector<8x1xi32>
    %cst = arith.constant dense<0.000000e+00> : vector<8x8xf32>
    %7 = tpu.matmul %3, %5, %cst {dimension_numbers = #tpu.dot_dimension_numbers<[1], [1], [0], [0], [0, 0, 1, 0], [], []>} : vector<8x32xbf16>, vector<8x32xbf16>, vector<8x8xf32> -> vector<8x8xf32>
    %8 = tpu.iota {dimensions = array<i32: 1>} : vector<8x128xi32>
    %9 = vector.broadcast %6 : vector<8x1xi32> to vector<8x128xi32>
    %10 = arith.cmpi eq, %8, %9 : vector<8x128xi32>
    %c8_i32 = arith.constant 8 : i32
    %11 = arith.muli %arg0, %c8_i32 : i32
    %c18_i32 = arith.constant 18 : i32
    %12 = arith.subi %c18_i32, %11 : i32
    %13 = tpu.iota {dimensions = array<i32: 0>} : vector<8x128xi32>
    %14 = vector.broadcast %12 : i32 to vector<8x128xi32>
    %15 = arith.cmpi slt, %13, %14 : vector<8x128xi32>
    %16 = arith.andi %10, %15 : vector<8x128xi1>
    %17 = tpu.iota {dimensions = array<i32: 1>} : vector<8x8xi32>
    %18 = vector.broadcast %12 : i32 to vector<8x8xi32>
    %19 = arith.cmpi slt, %17, %18 : vector<8x8xi32>
    %cst_6 = arith.constant 0.000000e+00 : f32
    %20 = vector.broadcast %cst_6 : f32 to vector<8x8xf32>
    %21 = arith.select %19, %7, %20 : vector<8x8xi1>, vector<8x8xf32>
    %22 = arith.extui %16 : vector<8x128xi1> to vector<8x128xi32>
    %23 = arith.sitofp %22 : vector<8x128xi32> to vector<8x128xf32>
    %c0_7 = arith.constant 0 : index
    %c0_8 = arith.constant 0 : index
    %24 = vector.load %arg6[%c0_7, %c0_8] : memref<8x128xf32, #tpu.memory_space<vmem>>, vector<8x128xf32>
    %cst_9 = arith.constant dense<0.000000e+00> : vector<8x128xf32>
    %25 = tpu.matmul %21, %23, %cst_9 {dimension_numbers = #tpu.dot_dimension_numbers<[1], [0], [0], [1], [0, 0, 1, 1], [], []>} : vector<8x8xf32>, vector<8x128xf32>, vector<8x128xf32> -> vector<8x128xf32>
    %26 = arith.addf %24, %25 : vector<8x128xf32>
    %c0_10 = arith.constant 0 : index
    %c0_11 = arith.constant 0 : index
    %27 = vector.load %arg6[%c0_10, %c0_11] : memref<8x128xf32, #tpu.memory_space<vmem>>, vector<8x128xf32>
    tpu.vector_store %arg6[%c0_10, %c0_11], %26 {strides = array<i32>} : memref<8x128xf32, #tpu.memory_space<vmem>>, vector<8x128xf32>,
    %c0_12 = arith.constant 0 : index
    %c0_13 = arith.constant 0 : index
    %28 = vector.load %arg7[%c0_12, %c0_13] : memref<1x128xf32, #tpu.memory_space<vmem>>, vector<1x128xf32>
    %cst_14 = arith.constant dense<0.000000e+00> : vector<128xf32>
    %29 = vector.multi_reduction <add>, %23, %cst_14 [0] : vector<8x128xf32> to vector<128xf32>
    %30 = vector.shape_cast %29 : vector<128xf32> to vector<1x128xf32>
    %31 = arith.addf %28, %30 : vector<1x128xf32>
    %c0_15 = arith.constant 0 : index
    %c0_16 = arith.constant 0 : index
    %32 = vector.load %arg7[%c0_15, %c0_16] : memref<1x128xf32, #tpu.memory_space<vmem>>, vector<1x128xf32>
    tpu.vector_store %arg7[%c0_15, %c0_16], %31 {strides = array<i32>} : memref<1x128xf32, #tpu.memory_space<vmem>>, vector<1x128xf32>,
    %c2_i32 = arith.constant 2 : i32
    %33 = arith.cmpi eq, %arg0, %c2_i32 : i32
    %34 = arith.extui %33 : i1 to i32
    %c0_i32_17 = arith.constant 0 : i32
    %35 = arith.cmpi ne, %34, %c0_i32_17 : i32
    scf.if %35 {
      %c0_18 = arith.constant 0 : index
      %c0_19 = arith.constant 0 : index
      %36 = vector.load %arg7[%c0_18, %c0_19] : memref<1x128xf32, #tpu.memory_space<vmem>>, vector<1x128xf32>
      %cst_20 = arith.constant 0.000000e+00 : f32
      %37 = vector.broadcast %cst_20 : f32 to vector<1x128xf32>
      %38 = arith.cmpf ogt, %36, %37 : vector<1x128xf32>
      %39 = arith.extui %38 : vector<1x128xi1> to vector<1x128xi32>
      %40 = arith.sitofp %39 : vector<1x128xi32> to vector<1x128xf32>
      %41 = arith.mulf %40, %36 : vector<1x128xf32>
      %cst_21 = arith.constant 1.000000e+00 : f32
      %42 = vector.broadcast %cst_21 : f32 to vector<1x128xf32>
      %43 = arith.subf %42, %40 : vector<1x128xf32>
      %44 = arith.addf %41, %43 : vector<1x128xf32>
      %c0_22 = arith.constant 0 : index
      %c0_23 = arith.constant 0 : index
      %45 = vector.load %arg6[%c0_22, %c0_23] : memref<8x128xf32, #tpu.memory_space<vmem>>, vector<8x128xf32>
      %cst_24 = arith.constant 2.000000e+01 : f32
      %46 = vector.broadcast %cst_24 : f32 to vector<1x128xf32>
      %47 = arith.divf %46, %44 : vector<1x128xf32>
      %48 = vector.broadcast %47 : vector<1x128xf32> to vector<8x128xf32>
      %49 = arith.mulf %45, %48 : vector<8x128xf32>
      %50 = math.exp %49 : vector<8x128xf32>
      %51 = vector.broadcast %40 : vector<1x128xf32> to vector<8x128xf32>
      %52 = arith.mulf %50, %51 : vector<8x128xf32>
      %cst_25 = arith.constant dense<0.000000e+00> : vector<8xf32>
      %53 = vector.multi_reduction <add>, %52, %cst_25 [1] : vector<8x128xf32> to vector<8xf32>
      %54 = vector.shape_cast %53 : vector<8xf32> to vector<8x1xf32>
      %cst_26 = arith.constant 9.99999997E-7 : f32
      %55 = vector.broadcast %cst_26 : f32 to vector<8x1xf32>
      %56 = arith.addf %54, %55 : vector<8x1xf32>
      %57 = vector.broadcast %56 : vector<8x1xf32> to vector<8x128xf32>
      %58 = arith.divf %52, %57 : vector<8x128xf32>
      %cst_27 = arith.constant 9.99999993E-9 : f32
      %59 = vector.broadcast %cst_27 : f32 to vector<8x128xf32>
      %60 = arith.addf %58, %59 : vector<8x128xf32>
      %61 = math.log %60 : vector<8x128xf32>
      %c0_28 = arith.constant 0 : index
      %c0_29 = arith.constant 0 : index
      %62 = vector.load %arg4[%c0_28, %c0_29] : memref<8x128xf32, #tpu.memory_space<vmem>>, vector<8x128xf32>
      %63 = arith.mulf %62, %61 : vector<8x128xf32>
      %cst_30 = arith.constant dense<0.000000e+00> : vector<8xf32>
      %64 = vector.multi_reduction <add>, %63, %cst_30 [1] : vector<8x128xf32> to vector<8xf32>
      %65 = vector.shape_cast %64 : vector<8xf32> to vector<8x1xf32>
      %cst_31 = arith.constant 0.000000e+00 : f32
      %66 = vector.broadcast %cst_31 : f32 to vector<8x1xf32>
      %67 = arith.subf %66, %65 : vector<8x1xf32>
      %cst_32 = arith.constant dense<0.000000e+00> : vector<1xf32>
      %68 = vector.multi_reduction <add>, %67, %cst_32 [0] : vector<8x1xf32> to vector<1xf32>
      %69 = vector.shape_cast %68 : vector<1xf32> to vector<1x1xf32>
      %cst_33 = arith.constant 2.500000e-01 : f32
      %70 = vector.broadcast %cst_33 : f32 to vector<1x1xf32>
      %71 = arith.mulf %69, %70 : vector<1x1xf32>
      %c0_34 = arith.constant 0 : index
      %c0_35 = arith.constant 0 : index
      %72 = vector.load %arg5[%c0_34, %c0_35] : memref<1x1xf32, #tpu.memory_space<vmem>>, vector<1x1xf32>
      tpu.vector_store %arg5[%c0_34, %c0_35], %71 {strides = array<i32>} : memref<1x1xf32, #tpu.memory_space<vmem>>, vector<1x1xf32>,
    } else {
    }
    return
  }
  func.func @transform_0(%arg0: i32) -> (i32, i32) {
    %c0_i32 = arith.constant 0 : i32
    %c0_i32_0 = arith.constant 0 : i32
    %c0_i32_1 = arith.constant 0 : i32
    return %c0_i32, %c0_i32_0 : i32, i32
  }
  func.func @transform_1(%arg0: i32) -> (i32, i32) {
    %c0_i32 = arith.constant 0 : i32
    %c0_i32_0 = arith.constant 0 : i32
    return %arg0, %c0_i32 : i32, i32
  }
  func.func @transform_2(%arg0: i32) -> (i32, i32) {
    %c0_i32 = arith.constant 0 : i32
    %c0_i32_0 = arith.constant 0 : i32
    return %arg0, %c0_i32 : i32, i32
  }
  func.func @transform_3(%arg0: i32) -> (i32, i32) {
    %c0_i32 = arith.constant 0 : i32
    %c0_i32_0 = arith.constant 0 : i32
    %c0_i32_1 = arith.constant 0 : i32
    return %c0_i32, %c0_i32_0 : i32, i32
  }
  func.func @transform_4(%arg0: i32) -> (i32, i32) {
    %c0_i32 = arith.constant 0 : i32
    %c0_i32_0 = arith.constant 0 : i32
    %c0_i32_1 = arith.constant 0 : i32
    return %c0_i32, %c0_i32_0 : i32, i32
  }
}

</mosaic_0001>

<bundles_post_ra>
// kernel: hybrid_memory_forward.1
= control target key start
LH: loop header
LB: loop body
LE: loop exit
PB: predicated region body
PF: predicated region fallthrough
CT: control target
= control target key end

     0   :  { %9 = vsyncpa [#allocation5], 0  ;;  %s602_s15 = smov 0   ;;  %s655_s0 = inlined_call_operand.vmem [shape: bf16[8,32], index: 0, kind: input, shape index: {}]   ;;  %s656_s1 = inlined_call_operand.vmem [shape: f32[18,32], index: 1, kind: input, shape index: {}]   ;;  %s657_s2 = inlined_call_operand.vmem [shape: s32[18,1], index: 2, kind: input, shape index: {}]   ;;  %s658_s3 = inlined_call_operand.vmem [shape: f32[8,128], index: 3, kind: input, shape index: {}]   ;;  %s659_s4 = inlined_call_operand.hbm [shape: f32[1,1], index: 4, kind: output, shape index: {}]  }
   0x1 LB: > { %s608_s16 = sadd.s32 4294967295, %s568_s15   ;;  %p472_p0 = scmp.ge.s32.totalorder %s568_s15, 1  ;;  %s568_s15 = sphi %s602_s15, %s15_s15  }
   0x2   : > { %p166_p1 = scmp.lt.s32.totalorder %s568_s15, 4 }
   0x4   : > { %p167_p2 = pnand %p472_p0, %p166_p1 }
   0x5   : > { %p190_p3 = scmp.lt.s32.totalorder (!%p167_p2), %s608_s16, 2  ;;  %p475_p4 = scmp.ne.s32.totalorder (!%p167_p2), %s608_s16, 0 }
   0x6   : > { %170 = sbr.rel (%p167_p2) target bundleno = 842 (0x34a), region = 36 }
   0xd   : > { %s191_s17 = scalar_select %p190_p3, %s608_s16, 2 }
   0xe   : > { %202 = sbr.rel (%p475_p4) target bundleno = 21 (0x15), region = 40  ;;  %v570_v0 = vmov (!%p475_p4), 0.0  }
   0xf   : > { %s473_s18 = sshll.u32 %s191_s17, 3  ;;  %203 = vst [vmem:[#allocation2] sm:$0xff] (!%p475_p4), %v570_v0  ;;  %204 = vst [vmem:[#allocation3] sm:$0x1] (!%p475_p4), %v570_v0 }
  0x10   : > { %s193_s21 = scalar_lea.vmem %s656_s1, %s473_s18  ;;  %s197_s24 = scalar_lea.vmem %s657_s2, %s473_s18 }
  0x15 PF: > { %v206_v1 = vld [vmem:[%s193_s21] sm:$0xff]  ;;  %vm209_vm0 = vcmask 261120   ;;  %v571_v2 = vmov 0.0   ;;  %vm572_vm1 = vmmov 0   ;;  %v573_v5 = vmov 0   ;;  %s477_s27 = sshll.u32 %s608_s16, 3 }
  0x16   : > { %491 = vmatprep.subr.bf16.mxu0 %v571_v2  ;;  %v207_v3 = vpack.c.bf16 %v206_v1, %v206_v1  ;;  %493 = vmatprep.mubr.msk.bf16.mxu0 %vm572_vm1, %v571_v2  ;;  %v208_v4 = vld [vmem:[%s197_s24] sm:$0xff]  ;;  %v256_v8 = vlaneseq  ;;  %s263_s28 = ssub.s32 18, %s477_s27  ;;  %v574_v14 = vmov 1.0   ;;  %v350_v20 = vld [vmem:[#allocation3] sm:$0x1]  ;;  %vm274_vm6 = vcmask 64512  }
  0x17   : > { %523 = vset.pattern.permute.xlu0 %v573_v5  ;;  %497 = vmatprep.subr.mxu1 %v571_v2  ;;  %v205_v7 = vld [vmem:[%s655_s0] sm:$0xf]  ;;  %v266_v10 = vstv %s263_s28  ;;  %p481_p5 = scmp.ne.s32.totalorder %s608_s16, 2 }
  0x18   : > { %v214_v6 = vsel %vm209_vm0, %v207_v3, 0  ;;  %259 = vperm.xlu0 %523, %v208_v4   ;;  %499 = vmatprep.mubr.msk.f32.mxu1 %vm572_vm1, %v571_v2  ;;  %v265_v9 = vshrl.u32 %v256_v8, 7  ;;  %v257_v11 = vand.u32 127, %v256_v8  ;;  %v273_v28 = vld [vmem:[#allocation2] sm:$0xff]  ;;  %v575_v33 = vmov (!%p481_p5), 0.0  }
  0x19   : > { %492 = vmatpush3.bf16.xpose.msra.mxu0 %v214_v6  ;;  %v397_v54 = vld [vmem:[%s658_s3] sm:$0xff] (!%p481_p5)  ;;  %vm409_vm8 = vcmask (!%p481_p5), 0  }
  0x1a   : > { %vm267_vm2 = vcmp.lt.s32.totalorder %v265_v9, %v266_v10  ;;  %vm269_vm5 = vcmp.lt.s32.totalorder %v257_v11, %v266_v10  ;;  %v376_v38 = vsub.s32 (!%p481_p5), 0, %v265_v9 }
  0x20   : > { %494 = vmatmul.mubr.msk.bf16.vlgmr.msra.gmra.mrb[0].mxu0 %vm209_vm0, %v205_v7 }
  0x97   : > { %v260_v12 = vpop.permute.xlu0 %259 }
  0x98   : > { %vm261_vm3 = vcmp.eq.s32.totalorder %v257_v11, %v260_v12 }
  0x99   : > { %vm268_vm4 = vmand %vm261_vm3, %vm267_vm2 }
  0x9a   : > { %v478_v13 = vsel %vm268_vm4, 1.0, %v571_v2  ;;  %498 = vmatpush3.msk.msra.mxu1 %vm268_vm4, %v574_v14 }
  0x9b   : > { %v351_v15 = vrot.slane %v478_v13, 4 }
  0x9d   : > { %v352_v16 = vadd.f32 %v478_v13, %v351_v15 }
  0x9f   : > { %v353_v17 = vrot.slane %v352_v16, 2 }
  0xa1   : > { %v354_v18 = vadd.f32 %v353_v17, %v352_v16 }
  0xa3   : > { %v355_v19 = vrot.slane %v354_v18, 1 }
  0xa5   : > { %v356_v21 = vadd.f32 %v355_v19, %v354_v18 }
  0xa7   : > { %v357_v22 = vadd.f32 %v356_v21, %v350_v20 }
  0xa9   : > { %358 = vst [vmem:[#allocation3] sm:$0x1] %v357_v22 }
  0xb0   : > { %v363_v32 = vld [vmem:[#allocation3] sm:$0x1] (!%p481_p5) }
  0xb1   : > { %vm364_vm7 = vcmp.gt.f32.partialorder (!%p481_p5), %v363_v32, 0.0 }
  0xb2   : > { %v482_v34 = vsel (!%p481_p5), %vm364_vm7, 1.0, %v575_v33 }
  0xb3   : > { %v367_v35 = vmul.f32 (!%p481_p5), %v482_v34, %v363_v32  ;;  %v368_v36 = vsub.f32 (!%p481_p5), 1.0, %v482_v34  ;;  %v386_v45 = vrot.slane (!%p481_p5), %v482_v34, %v376_v38 }
  0xb5   : > { %v369_v37 = vadd.f32 (!%p481_p5), %v368_v36, %v367_v35 }
  0xb7   : > { %524 = vrcp.f32 (!%p481_p5), %v369_v37 }
  0xc1   : > { %v525_v39 = vpop.eup (!%p481_p5), %524 }
  0xc2   : > { %v372_v40 = vmul.f32 (!%p481_p5), 20.0, %v525_v39 }
  0xc4   : > { %v377_v42 = vrot.slane (!%p481_p5), %v372_v40, %v376_v38 }
  0xf3   : > { %v250_v23 = vpop.f32.mrb[0].mxu0 }
  0xf4   : > { %v270_v24 = vsel %vm269_vm5, %v250_v23, 0.0  ;;  %v495_v25 = vpop.f32.mrb[1].mxu0 }
  0xf5   : > { %v253_v26 = vpop.f32.mrb[2].mxu0  ;;  %500 = vmatmul.mubr.msk.f32.vlgmr.msra.gmra.mrb[0].mxu1 %vm274_vm6, %v270_v24 }
  0xf6   : > { %v496_v27 = vpop.f32.mrb[3].mxu0 }
 0x1c5   : > { %362 = sbr.rel (%p481_p5) target bundleno = 817 (0x331), region = 44 }
 0x1c8   : > { %v344_v29 = vpop.f32.mrb[0].mxu1 }
 0x1c9   : > { %v348_v30 = vadd.f32 %v344_v29, %v273_v28  ;;  %v501_v31 = vpop.f32.mrb[1].mxu1 }
 0x1cb   : > { %349 = vst [vmem:[#allocation2] sm:$0xff] %v348_v30 }
 0x1d2   : > { %v370_v41 = vld [vmem:[#allocation2] sm:$0xff] }
 0x1d3   : > { %v379_v43 = vmul.f32 %v377_v42, %v370_v41 }
 0x1d5   : > { %v380_v44 = vmul.f32 1.442695, %v379_v43 }
 0x1d7   : > { %526 = vpow2.f32 %v380_v44 }
 0x1e1   : > { %v527_v46 = vpop.eup %526 }
 0x1e2   : > { %v388_v47 = vmul.f32 %v527_v46, %v386_v45 }
 0x1e4   : > { %389 = vadd.xlane.f32.xlu0 %v388_v47 }
 0x271   : > { %v390_v48 = vpop.xlane.xlu0 %389 }
 0x272   : > { %v391_v49 = vadd.f32 1e-06, %v390_v48 }
 0x274   : > { %528 = vrcp.f32 %v391_v49 }
 0x27e   : > { %v529_v50 = vpop.eup %528 }
 0x27f   : > { %v393_v51 = vmul.f32 %v529_v50, %v388_v47 }
 0x281   : > { %v394_v52 = vadd.f32 1e-08, %v393_v51 }
 0x283   : > { %530 = vlog2.f32 %v394_v52 }
 0x28d   : > { %v531_v53 = vpop.eup %530 }
 0x28e   : > { %v396_v55 = vmul.f32 0.6931472, %v531_v53 }
 0x290   : > { %v398_v56 = vmul.f32 %v397_v54, %v396_v55 }
 0x292   : > { %399 = vadd.xlane.f32.xlu0 %v398_v56 }
 0x31f   : > { %v400_v57 = vpop.xlane.xlu0 %399 }
 0x320   : > { %v401_v58 = vsub.f32 0.0, %v400_v57 }
 0x322   : > { %v402_v59 = vrot.slane %v401_v58, 4 }
 0x324   : > { %v403_v60 = vadd.f32 %v402_v59, %v401_v58 }
 0x326   : > { %v404_v61 = vrot.slane %v403_v60, 2 }
 0x328   : > { %v405_v62 = vadd.f32 %v404_v61, %v403_v60 }
 0x32a   : > { %v406_v63 = vrot.slane %v405_v62, 1 }
 0x32c   : > { %v407_v0 = vadd.f32 %v406_v63, %v405_v62 }
 0x32e   : > { %v408_v1 = vmul.f32 0.25, %v407_v0 }
 0x330   : > { %410 = vst.msk [vmem:[#allocation4] sm:$0x1] %vm409_vm8, %v408_v1 }
 0x331 PF: > { %p506_p6 = scmp.eq.s32.totalorder %s608_s16, 2  ;;  %s576_s5 = smov [#allocation4]  }
 0x332   : > { %s418_s6 = sshll.u32 %s576_s5, 4  ;;  %s419_s6 = int_to_ptr.vmem [resolvable:$true] %s418_s6 }
 0x333   : > { %s532_s7 = scalar_lea.vmem %s419_s6, 16  ;;  %s538_s8 = scalar_lea.vmem %s419_s6, 32 }
 0x334   : > { %p533_p7 = scmp.ne.s32.totalorder %s419_s6, %s532_s7  ;;  %p539_p10 = scmp.lt.s32.totalorder %s419_s6, %s419_s6 }
 0x335   : > { %p540_p11 = scmp.lt.s32.totalorder %s538_s8, %s532_s7 }
 0x336   : > { %p534_p8 = pnand %p533_p7, %p506_p6 }
 0x337   : > { %p541_p12 = por %p540_p11, %p539_p10 }
 0x338   : > { %p535_p9 = pneg %p534_p8 }
 0x33a   : > { %p542_p13 = pnand %p541_p12, %p535_p9 }
 0x33c   : > { %545 = shalt.err (!%p542_p13)
}
 0x33d   : > { %s546_s11 = scalar_lea.hbm %s659_s4, 16 }
 0x33e   : > { %p547_p0 = scmp.ne.s32.totalorder %s659_s4, %s546_s11  ;;  %p552_p3 = scmp.lt.u32.totalorder %s546_s11, %s659_s4 }
 0x340   : > { %p548_p1 = pnand %p547_p0, %p506_p6 }
 0x342   : > { %p549_p2 = pneg %p548_p1 }
 0x344   : > { %p554_p4 = pnand %p552_p3, %p549_p2 }
 0x346   : > { %557 = shalt.err (!%p554_p4)
}
 0x347   : > { %503 = dma.vmem_to_hbm [thread:$0]  (%p506_p6), %s419_s6, 16, %s659_s4, [#allocation5]  }
 0x348   : > { %563 = dma.done.wait (%p506_p6), [#allocation5], 16  }
 0x349   : > { %565 = vsyncadd (%p506_p6), [#allocation5], 4294967280 }
 0x34a PF: > { %s15_s15 = sadd.s32 1, %s568_s15  }
 0x34b   : > { %p12_p5 = scmp.ge.s32.totalorder %s15_s15, 5  }
 0x34d   :  { %14 = sbr.rel (!%p12_p5) target bundleno = 1 (0x1), region = 74 }
 0x354   :  { %431 = vsyncpa [#allocation5], 1 }
 0x355   :  { %433 = vsyncpa [#allocation5 + $0x1], 1 }

</bundles_post_ra>
